<compile_context>
chip_gen: v7x
topology: tpu7x:2x2x1
jax: 0.10.0
libtpu: 0.0.40
codegen_flags: <defaults>
</compile_context>

<pallas_src>
import jax
import jax.numpy as jnp
from jax.experimental import pallas as pl
from jax.experimental.pallas import tpu as pltpu


def _round_up(n, m):
    return ((n + m - 1) // m) * m


def _mlp_kernel_fm(x_ref, w1_ref, b1_ref, w2_ref, b2_ref, o_ref):
    """Feature-major MLP tile: everything is (features, batch)-shaped.

    x_ref : (in_dim, tb)   batch on the 128-lane axis -> lane-dense reads
    w1_ref: (16, in_dim)   PyTorch fc1.weight, used as-is
    b1_ref: (16, 1)
    w2_ref: (out_dim, 16)  PyTorch fc2.weight, used as-is
    b2_ref: (out_dim, 1)
    o_ref : (out_dim, tb)  lane-dense output stores (full-width vst)
    """
    # fc1 on the MXU, f32 accumulation.
    h = jnp.dot(w1_ref[...], x_ref[...], preferred_element_type=jnp.float32)
    # Bias-add + ReLU in f32 on the VPU (biases are kept f32).
    h = jnp.maximum(h + b1_ref[...], 0.0)
    # fc2: cast ONLY the MXU input to the weight dtype (no-op in f32);
    # accumulation stays f32.
    y = jnp.dot(w2_ref[...], h.astype(w2_ref.dtype),
                preferred_element_type=jnp.float32)
    o_ref[...] = (y + b2_ref[...]).astype(o_ref.dtype)


def mlp_forward_fm(x_t, w1, b1, w2, b2, *, block_b=None, out_dtype=None,
                   vmem_limit_bytes=None):
    """Net forward in feature-major layout (the lane-dense fast path).

    x_t: (in_dim, B)      -- batch on the minor/lane axis
    w1 : (16, in_dim)      b1: (16,)      (PyTorch fc1.weight / fc1.bias)
    w2 : (out_dim, 16)     b2: (out_dim,) (PyTorch fc2.weight / fc2.bias)
    returns y_t: (out_dim, B)
    """
    in_dim, B = x_t.shape
    hidden = w1.shape[0]
    out_dim = w2.shape[0]
    out_dtype = out_dtype if out_dtype is not None else x_t.dtype

    # Only the tiny weights are cast to the activation dtype (never x: a
    # wrapper-side cast of x would be an extra un-fused HBM pass).
    # TODO(synk): folding b1/b2 into augmented weight columns would drop two
    # tiny resident operands; kept separate for clarity (negligible traffic).
    w1 = w1.astype(x_t.dtype)
    w2 = w2.astype(x_t.dtype)
    b1 = jnp.reshape(b1, (hidden, 1)).astype(jnp.float32)
    b2 = jnp.reshape(b2, (out_dim, 1)).astype(jnp.float32)

    itemsize = jnp.dtype(x_t.dtype).itemsize
    cost = pl.CostEstimate(
        flops=2 * B * (in_dim * hidden + hidden * out_dim),
        transcendentals=0,
        bytes_accessed=(x_t.size * itemsize
                        + B * out_dim * jnp.dtype(out_dtype).itemsize
                        + (w1.size + w2.size) * itemsize
                        + (b1.size + b2.size) * 4),
    )

    # ---- Tile-size heuristic ------------------------------------------------
    #  * >=2048-lane tiles amortize the ~0.35 us/step pipeline overhead;
    #  * keep grid >= 2 when possible so both v7x TensorCores are busy;
    #  * 8192-lane f32 x tile = 1 MiB/buffer -> fits v5e's 16 MiB and v7x's
    #    32 MiB default scoped VMEM with double-buffering to spare.
    if block_b is None:
        if B <= 2048:
            block_b = B                                   # single-shot path
        else:
            block_b = min(8192, _round_up(pl.cdiv(B, 2), 128))
    if block_b < B:
        block_b = _round_up(block_b, 128)                 # lane-axis tiling rule

    if block_b >= B:
        # Whole problem resident in VMEM: no grid, no pipeline prologue/epilogue.
        return pl.pallas_call(
            _mlp_kernel_fm,
            out_shape=jax.ShapeDtypeStruct((out_dim, B), out_dtype),
            cost_estimate=cost,
            compiler_params=pltpu.CompilerParams(
                vmem_limit_bytes=vmem_limit_bytes),
        )(x_t, w1, b1, w2, b2)

    # Gridded path: stream lane-dense batch tiles of x, keep the tiny weights
    # resident (constant index_maps).  Grid runs over the UNPADDED arrays; the
    # trailing partial block is masked on store by Pallas (no jnp.pad / slice).
    grid_b = pl.cdiv(B, block_b)
    return pl.pallas_call(
        _mlp_kernel_fm,
        out_shape=jax.ShapeDtypeStruct((out_dim, B), out_dtype),
        grid=(grid_b,),
        in_specs=[
            pl.BlockSpec((in_dim, block_b), lambda i: (0, i)),   # x^T: streamed
            pl.BlockSpec((hidden, in_dim), lambda i: (0, 0)),    # weights and
            pl.BlockSpec((hidden, 1), lambda i: (0, 0)),         # biases stay
            pl.BlockSpec((out_dim, hidden), lambda i: (0, 0)),   # resident
            pl.BlockSpec((out_dim, 1), lambda i: (0, 0)),
        ],
        out_specs=pl.BlockSpec((out_dim, block_b), lambda i: (0, i)),
        cost_estimate=cost,
        compiler_params=pltpu.CompilerParams(
            dimension_semantics=("parallel",),    # batch tiles independent
            vmem_limit_bytes=vmem_limit_bytes),
    )(x_t, w1, b1, w2, b2)


def mlp_forward(x, w1, b1, w2, b2, **kwargs):
    """PyTorch-layout entry point: x (B, in_dim) -> (B, out_dim).

    Internally runs the lane-dense feature-major kernel; the x transpose is a
    single layout pass.  Producers that can emit x already as (in_dim, B)
    should call mlp_forward_fm directly and skip it.
    """
    y_t = mlp_forward_fm(jnp.transpose(x), w1, b1, w2, b2, **kwargs)
    return jnp.transpose(y_t)


def init_params(key, in_dim, out_dim, fc1_units=16, dtype=jnp.float32):
    """nn.Linear-style init, weights in PyTorch (out_features, in_features) layout."""
    k1, k2, k3, k4 = jax.random.split(key, 4)
    lim1 = 1.0 / jnp.sqrt(jnp.float32(in_dim))
    lim2 = 1.0 / jnp.sqrt(jnp.float32(fc1_units))
    w1 = jax.random.uniform(k1, (fc1_units, in_dim), dtype, -lim1, lim1)
    b1 = jax.random.uniform(k2, (fc1_units,), dtype, -lim1, lim1)
    w2 = jax.random.uniform(k3, (out_dim, fc1_units), dtype, -lim2, lim2)
    b2 = jax.random.uniform(k4, (out_dim,), dtype, -lim2, lim2)
    return w1, b1, w2, b2


def _reference(x, w1, b1, w2, b2):
    return jnp.maximum(x @ w1.T + b1, 0.0) @ w2.T + b2


if __name__ == "__main__":
    key = jax.random.PRNGKey(0)
    k_x, k_x2, k_p = jax.random.split(key, 3)

    in_dim, out_dim = 32, 4
    w1, b1, w2, b2 = init_params(k_p, in_dim, out_dim)

    # 1) Tiny batch (module-spec scale): no-grid path, whole problem in VMEM.
    x_small = jax.random.normal(k_x, (8, in_dim), jnp.float32)
    out_small = mlp_forward(x_small, w1, b1, w2, b2)
    jax.block_until_ready(out_small)
    ref_small = _reference(x_small, w1, b1, w2, b2)
    assert out_small.shape == (8, out_dim)
    assert jnp.allclose(out_small, ref_small, atol=1e-5, rtol=1e-5)

    # 2) Larger batch, not a multiple of the tile: gridded lane-dense path with
    #    a masked trailing partial block (no pad / slice in the wrapper).
    x_big = jax.random.normal(k_x2, (1000, in_dim), jnp.float32)
    out_big = mlp_forward(x_big, w1, b1, w2, b2, block_b=256)
    jax.block_until_ready(out_big)
    ref_big = _reference(x_big, w1, b1, w2, b2)
    assert out_big.shape == (1000, out_dim)
    assert jnp.allclose(out_big, ref_big, atol=1e-5, rtol=1e-5)

    # 3) Feature-major entry point (preferred when the producer can emit
    #    (in_dim, B) directly): avoids even the wrapper-side transpose pass.
    out_fm = mlp_forward_fm(jnp.transpose(x_big), w1, b1, w2, b2, block_b=512)
    jax.block_until_ready(out_fm)
    assert out_fm.shape == (out_dim, 1000)
    assert jnp.allclose(jnp.transpose(out_fm), ref_big, atol=1e-5, rtol=1e-5)

    print("KERNEL_OK")
</pallas_src>

<mosaic_0001>
module attributes {stable_mosaic.version = 11 : i64} {
  func.func @_mlp_kernel_fm(%arg0: memref<32x8xf32, #tpu.memory_space<vmem>>, %arg1: memref<16x32xf32, #tpu.memory_space<vmem>>, %arg2: memref<16x1xf32, #tpu.memory_space<vmem>>, %arg3: memref<4x16xf32, #tpu.memory_space<vmem>>, %arg4: memref<4x1xf32, #tpu.memory_space<vmem>>, %arg5: memref<4x8xf32, #tpu.memory_space<vmem>>) attributes {dimension_semantics = [], scalar_prefetch = 0 : i64, scratch_operands = 0 : i64, tpu.core_type = #tpu.core_type<tc>} {
    %c0 = arith.constant 0 : index
    %c0_0 = arith.constant 0 : index
    %0 = vector.load %arg1[%c0, %c0_0] : memref<16x32xf32, #tpu.memory_space<vmem>>, vector<16x32xf32>
    %c0_1 = arith.constant 0 : index
    %c0_2 = arith.constant 0 : index
    %1 = vector.load %arg0[%c0_1, %c0_2] : memref<32x8xf32, #tpu.memory_space<vmem>>, vector<32x8xf32>
    %cst = arith.constant dense<0.000000e+00> : vector<16x8xf32>
    %2 = tpu.matmul %0, %1, %cst {dimension_numbers = #tpu.dot_dimension_numbers<[1], [0], [0], [1], [0, 0, 1, 1], [], []>} : vector<16x32xf32>, vector<32x8xf32>, vector<16x8xf32> -> vector<16x8xf32>
    %c0_3 = arith.constant 0 : index
    %c0_4 = arith.constant 0 : index
    %3 = vector.load %arg2[%c0_3, %c0_4] : memref<16x1xf32, #tpu.memory_space<vmem>>, vector<16x1xf32>
    %4 = vector.broadcast %3 : vector<16x1xf32> to vector<16x8xf32>
    %5 = arith.addf %2, %4 : vector<16x8xf32>
    %cst_5 = arith.constant 0.000000e+00 : f32
    %6 = vector.broadcast %cst_5 : f32 to vector<16x8xf32>
    %7 = arith.maximumf %5, %6 : vector<16x8xf32>
    %c0_6 = arith.constant 0 : index
    %c0_7 = arith.constant 0 : index
    %8 = vector.load %arg3[%c0_6, %c0_7] : memref<4x16xf32, #tpu.memory_space<vmem>>, vector<4x16xf32>
    %cst_8 = arith.constant dense<0.000000e+00> : vector<4x8xf32>
    %9 = tpu.matmul %8, %7, %cst_8 {dimension_numbers = #tpu.dot_dimension_numbers<[1], [0], [0], [1], [0, 0, 1, 1], [], []>} : vector<4x16xf32>, vector<16x8xf32>, vector<4x8xf32> -> vector<4x8xf32>
    %c0_9 = arith.constant 0 : index
    %c0_10 = arith.constant 0 : index
    %10 = vector.load %arg4[%c0_9, %c0_10] : memref<4x1xf32, #tpu.memory_space<vmem>>, vector<4x1xf32>
    %11 = vector.broadcast %10 : vector<4x1xf32> to vector<4x8xf32>
    %12 = arith.addf %9, %11 : vector<4x8xf32>
    %c0_11 = arith.constant 0 : index
    %c0_12 = arith.constant 0 : index
    %13 = vector.load %arg5[%c0_11, %c0_12] : memref<4x8xf32, #tpu.memory_space<vmem>>, vector<4x8xf32>
    tpu.vector_store %arg5[%c0_11, %c0_12], %12 {strides = array<i32>} : memref<4x8xf32, #tpu.memory_space<vmem>>, vector<4x8xf32>,
    return
  }
}

</mosaic_0001>

<bundles_post_ra>
// kernel: tpu_custom_call.1
= control target key start
LH: loop header
LB: loop body
LE: loop exit
PB: predicated region body
PF: predicated region fallthrough
CT: control target
= control target key end

     0   :  { %vm39_vm0 = vcmask 261120   ;;  %v292_v6 = vmov 0   ;;  %s371_s0 = inlined_call_operand.vmem [shape: f32[32,8], index: 0, kind: input, shape index: {}]   ;;  %s372_s1 = inlined_call_operand.vmem [shape: f32[16,32], index: 1, kind: input, shape index: {}]   ;;  %s373_s2 = inlined_call_operand.vmem [shape: f32[16,1], index: 2, kind: input, shape index: {}]   ;;  %s374_s3 = inlined_call_operand.vmem [shape: f32[4,16], index: 3, kind: input, shape index: {}]   ;;  %s375_s4 = inlined_call_operand.vmem [shape: f32[4,1], index: 4, kind: input, shape index: {}]   ;;  %s376_s5 = inlined_call_operand.hbm [shape: f32[4,8], index: 5, kind: output, shape index: {}]  }
   0x1   :  { %v23_v0 = vld [vmem:[%s371_s0] sm:$0xff]  ;;  %v24_v1 = vld [vmem:[%s371_s0 + $0x8] sm:$0xff]  ;;  %v25_v2 = vld [vmem:[%s371_s0 + $0x10] sm:$0xff]  ;;  %266 = vset.pattern.permute.xlu0 %v292_v6  ;;  %267 = vset.pattern.permute.xlu1 %v292_v6 }
   0x2   :  { %v250_v3 = vpack.c.bf16 %v24_v1, %v23_v0  ;;  %v26_v4 = vld [vmem:[%s371_s0 + $0x18] sm:$0xff]  ;;  %v21_v5 = vld [vmem:[%s372_s1] sm:$0xff] }
   0x3   :  { %v254_v7 = vpack.c.bf16 %v26_v4, %v25_v2  ;;  %240 = vmatprep.mubr.msk.f32.mxu0 %vm39_vm0, %v21_v5  ;;  %v27_v8 = vld [vmem:[%s373_s2] sm:$0xff] }
   0x4   :  { %10 = vsyncpa [#allocation3], 0  ;;  %251 = vmatprep.subr.bf16.mxu0 %v250_v3  ;;  %31 = vperm.xlu0 %266, %v27_v8   ;;  %v28_v9 = vld [vmem:[%s373_s2 + $0x8] sm:$0xff]  ;;  %v293_v11 = vmov 0.0|0.0   ;;  %vm294_vm1 = vmmov 0   ;;  %v295_v12 = vmov 0.0  }
   0x5   :  { %253 = vmatpush3.bf16.msra.mxu0 %v250_v3  ;;  %v22_v10 = vld [vmem:[%s372_s1 + $0x8] sm:$0xff]  ;;  %258 = vmatprep.subr.bf16.mxu1 %v293_v11  ;;  %v124_v13 = vld [vmem:[%s375_s4] sm:$0xf]  ;;  %vm130_vm2 = vcmask 130048   ;;  %s296_s10 = smov [#allocation2]   ;;  %vm204_vm3 = vcmask 60416  }
   0x6   :  { %255 = vmatprep.subr.bf16.mxu0 %v254_v7  ;;  %247 = vmatprep.mubr.msk.f32.mxu1 %vm294_vm1, %v295_v12  ;;  %v123_v23 = vld [vmem:[%s374_s3] sm:$0xf]  ;;  %s212_s4 = sshll.u32 %s296_s10, 4  ;;  %s213_s4 = int_to_ptr.vmem [resolvable:$true] %s212_s4 }
   0x7   :  { %127 = vperm.xlu1 %267, %v124_v13   ;;  %s268_s11 = scalar_lea.vmem %s213_s4, 64  ;;  %p273_p1 = scmp.lt.s32.totalorder %s213_s4, %s213_s4 }
   0x8   :  { %36 = vperm.xlu0 %266, %v28_v9   ;;  %p269_p0 = scmp.ne.s32.totalorder %s213_s4, %s268_s11  ;;  %p274_p2 = scmp.lt.s32.totalorder %s268_s11, %s268_s11 }
   0x9   :  { %257 = vmatpush3.bf16.msra.mxu0 %v254_v7 }
   0xa   :  { %p275_p3 = por %p274_p2, %p273_p1 }
   0xc   :  { %241 = vmatmul.mubr.msk.f32.vlgmr.msra.gmra.mrb[0].mxu0 %vm39_vm0, %v22_v10  ;;  %p276_p4 = pnand %p275_p3, %p269_p0 }
  0x83   :  { %v32_v14 = vpop.permute.xlu0 %31 }
  0x86   :  { %v128_v24 = vpop.permute.xlu1 %127 }
  0x87   :  { %v37_v15 = vpop.permute.xlu0 %36 }
  0xdf   :  { %v242_v16 = vpop.f32.mrb[0].mxu0 }
  0xe0   :  { %v118_v17 = vadd.f32 %v242_v16, %v37_v15  ;;  %v112_v18 = vpop.f32.mrb[1].mxu0 }
  0xe1   :  { %v113_v19 = vadd.f32 %v112_v18, %v32_v14 }
  0xe2   :  { %v122_v20 = vmax.f32 %v118_v17, 0.0 }
  0xe3   :  { %v121_v21 = vmax.f32 %v113_v19, 0.0 }
  0xe5   :  { %v259_v22 = vpack.c.bf16 %v122_v20, %v121_v21 }
  0xe7   :  { %260 = vmatpush3.bf16.msra.mxu1 %v259_v22 }
  0xea   :  { %248 = vmatmul.mubr.msk.f32.vlgmr.msra.gmra.mrb[0].mxu1 %vm130_vm2, %v123_v23 }
 0x1bd   :  { %v200_v25 = vpop.f32.mrb[0].mxu1 }
 0x1be   :  { %v201_v26 = vadd.f32 %v200_v25, %v128_v24  ;;  %v249_v27 = vpop.f32.mrb[1].mxu1 }
 0x1c0   :  { %205 = vst.msk [vmem:[#allocation2] sm:$0xf] %vm204_vm3, %v201_v26 }
 0x1c1   :  { %279 = shalt.err (!%p276_p4)
}
 0x1c2   :  { %s280_s13 = scalar_lea.hbm %s376_s5, 64 }
 0x1c3   :  { %p281_p5 = scmp.ne.s32.totalorder %s376_s5, %s280_s13  ;;  %p284_p6 = scmp.lt.u32.totalorder %s280_s13, %s376_s5 }
 0x1c5   :  { %p286_p7 = pnand %p284_p6, %p281_p5 }
 0x1c7   :  { %289 = shalt.err (!%p286_p7)
}
 0x1c8   :  { %215 = dma.vmem_to_hbm [thread:$0]  %s213_s4, 64, %s376_s5, [#allocation3]  }
 0x1c9   :  { %290 = dma.done.wait [#allocation3], 64  }
 0x1ca   :  { %291 = vsyncadd [#allocation3], 4294967232 }
 0x1cb   :  { %219 = vsyncpa [#allocation3], 1 }

</bundles_post_ra>
